<compile_context>
chip_gen: v7x
topology: tpu7x:2x2x1
jax: 0.10.0
libtpu: 0.0.40
codegen_flags: <defaults>
</compile_context>

<pallas_src>
import functools

import jax
import jax.numpy as jnp
from jax import lax
from jax.experimental import pallas as pl
from jax.experimental.pallas import tpu as pltpu


def _loss_sums_kernel(o_ref, t_ref, sse_ref, htv_ref, wtv_ref, *, width):
    """One grid step: accumulate partial sums for a (TB, H*W) slab of planes.

    o_ref, t_ref : (1, TB, H*W) blocks (TB flattened image planes, lane-dense)
    sse_ref, htv_ref, wtv_ref : (1, 1, 1) f32 accumulators, resident per shard
    width : static W, used to build the intra-plane boundary masks.
    """
    i = pl.program_id(1)

    @pl.when(i == 0)
    def _init():
        sse_ref[...] = jnp.zeros_like(sse_ref)
        htv_ref[...] = jnp.zeros_like(htv_ref)
        wtv_ref[...] = jnp.zeros_like(wtv_ref)

    o = o_ref[0].astype(jnp.float32)          # (TB, H*W)
    t = t_ref[0].astype(jnp.float32)          # (TB, H*W)
    tb, hw = o.shape

    # ---- MSE numerator: sum of squared error over this slab ----
    d = o - t
    sse_ref[...] += jnp.sum(d * d)

    # ---- TV terms on `output` only (matches TVLoss.forward(x=output)) ----
    # Each sublane row is one flattened (H, W) plane, so a lane roll stays
    # inside the plane.  np.roll semantics: roll(x, s, 1)[:, j] = x[:, j - s].
    lane = lax.broadcasted_iota(jnp.int32, (tb, hw), 1)
    if width & (width - 1) == 0:              # power-of-two fast path
        col = lane & (width - 1)
    else:
        col = lane % width

    # w-direction: o[h, w] - o[h, w-1], valid where column >= 1.
    dw = o - pltpu.roll(o, 1, 1)
    dw = jnp.where(col != 0, dw, 0.0)
    wtv_ref[...] += jnp.sum(dw * dw)

    # h-direction: o[h, w] - o[h-1, w], valid where row >= 1 (flat idx >= W).
    dh = o - pltpu.roll(o, width, 1)
    dh = jnp.where(lane >= width, dh, 0.0)
    htv_ref[...] += jnp.sum(dh * dh)


def _largest_divisor_at_most(n, cap):
    cap = max(1, min(n, cap))
    for d in range(cap, 0, -1):
        if n % d == 0:
            return d
    return 1


def denoise_loss_pallas(output, target, tv_loss_weight=1.0):
    """Pallas implementation of DenoiseLossFunction.forward(output, target)."""
    assert output.shape == target.shape
    N, C, H, W = output.shape
    NC = N * C
    HW = H * W
    itemsize = output.dtype.itemsize

    # Shard the plane axis across 2 TensorCores (v7x megacore); no-op on 1-TC
    # chips.  Fall back to 1 shard if the plane count is odd.
    num_shards = 2 if (NC >= 2 and NC % 2 == 0) else 1
    per_shard = NC // num_shards

    # Planes per block: keep 2 inputs x 2 pipeline buffers <= ~8 MiB so the
    # kernel fits the default scoped VMEM on every generation (v7x: 64 MiB
    # physical / 32 MiB scoped; v5e: 16 MiB default scoped).
    budget_bytes = 8 * 1024 * 1024
    cap = max(1, budget_bytes // (4 * HW * itemsize))
    tb = _largest_divisor_at_most(per_shard, cap)
    blocks_per_shard = per_shard // tb

    # Lane-dense slabs: (num_blocks_total, TB, H*W) — a pure reshape (no copy).
    o3 = output.reshape(NC // tb, tb, HW)
    t3 = target.reshape(NC // tb, tb, HW)

    in_spec = pl.BlockSpec(
        (1, tb, HW), lambda s, i: (s * blocks_per_shard + i, 0, 0))
    acc_spec = pl.BlockSpec((1, 1, 1), lambda s, i: (s, 0, 0))
    acc_shape = jax.ShapeDtypeStruct((num_shards, 1, 1), jnp.float32)

    kernel = functools.partial(_loss_sums_kernel, width=W)
    bytes_accessed = (output.size + target.size) * itemsize

    sse, htv, wtv = pl.pallas_call(
        kernel,
        out_shape=(acc_shape, acc_shape, acc_shape),
        grid_spec=pltpu.PrefetchScalarGridSpec(
            num_scalar_prefetch=0,
            grid=(num_shards, blocks_per_shard),
            in_specs=[in_spec, in_spec],
            out_specs=[acc_spec, acc_spec, acc_spec],
        ),
        compiler_params=pltpu.CompilerParams(
            dimension_semantics=("parallel", "arbitrary"),
            vmem_limit_bytes=32 * 1024 * 1024,
        ),
        cost_estimate=pl.CostEstimate(
            flops=10 * output.size,
            transcendentals=0,
            bytes_accessed=bytes_accessed,
        ),
    )(o3, t3)

    sse = jnp.sum(sse)
    htv = jnp.sum(htv)
    wtv = jnp.sum(wtv)

    # nn.MSELoss default reduction = 'mean'
    mse = sse / jnp.float32(N * C * H * W)

    # TVLoss: counts follow the PyTorch _tensor_size() (exclude batch dim).
    # TODO(synk): like the PyTorch original, this divides by zero if H==1 or W==1.
    count_h = jnp.float32(C * (H - 1) * W)
    count_w = jnp.float32(C * H * (W - 1))
    tv = tv_loss_weight * 2.0 * (htv / count_h + wtv / count_w) / jnp.float32(N)

    return jnp.float32(1e-07) * mse + tv


def denoise_loss_ref(output, target, tv_loss_weight=1.0):
    """Pure-JAX reference for correctness checking."""
    o = output.astype(jnp.float32)
    t = target.astype(jnp.float32)
    N, C, H, W = o.shape
    mse = jnp.mean((o - t) ** 2)
    h_tv = jnp.sum((o[:, :, 1:, :] - o[:, :, :-1, :]) ** 2)
    w_tv = jnp.sum((o[:, :, :, 1:] - o[:, :, :, :-1]) ** 2)
    count_h = C * (H - 1) * W
    count_w = C * H * (W - 1)
    tv = tv_loss_weight * 2.0 * (h_tv / count_h + w_tv / count_w) / N
    return 1e-07 * mse + tv


if __name__ == "__main__":
    key = jax.random.PRNGKey(0)
    k1, k2 = jax.random.split(key)

    # Small NCHW shapes consistent with the module's forward.
    N, C, H, W = 2, 4, 16, 16
    output = jax.random.uniform(k1, (N, C, H, W), dtype=jnp.float32)
    target = jax.random.uniform(k2, (N, C, H, W), dtype=jnp.float32)

    loss = jax.block_until_ready(denoise_loss_pallas(output, target))
    ref = jax.block_until_ready(denoise_loss_ref(output, target))

    assert jnp.isfinite(loss), "non-finite loss"
    assert jnp.allclose(loss, ref, rtol=1e-5, atol=1e-6), (loss, ref)

    print("KERNEL_OK")
</pallas_src>

<mosaic_0001>
module attributes {stable_mosaic.version = 11 : i64} {
  func.func @_loss_sums_kernel(%arg0: i32, %arg1: i32, %arg2: memref<1x4x256xf32, #tpu.memory_space<vmem>>, %arg3: memref<1x4x256xf32, #tpu.memory_space<vmem>>, %arg4: memref<1x1x1xf32, #tpu.memory_space<vmem>>, %arg5: memref<1x1x1xf32, #tpu.memory_space<vmem>>, %arg6: memref<1x1x1xf32, #tpu.memory_space<vmem>>) attributes {dimension_semantics = [#tpu.dimension_semantics<parallel>, #tpu.dimension_semantics<arbitrary>], iteration_bounds = array<i64: 2, 1>, scalar_prefetch = 0 : i64, scratch_operands = 0 : i64, tpu.core_type = #tpu.core_type<tc>, window_params = [{transform_indices = @transform_0, window_bounds = array<i64: 1, 4, 256>}, {transform_indices = @transform_1, window_bounds = array<i64: 1, 4, 256>}, {transform_indices = @transform_2, window_bounds = array<i64: 1, 1, 1>}, {transform_indices = @transform_3, window_bounds = array<i64: 1, 1, 1>}, {transform_indices = @transform_4, window_bounds = array<i64: 1, 1, 1>}]} {
    %c0_i32 = arith.constant 0 : i32
    %0 = arith.cmpi eq, %arg1, %c0_i32 : i32
    %1 = arith.extui %0 : i1 to i32
    %c0_i32_0 = arith.constant 0 : i32
    %2 = arith.cmpi ne, %1, %c0_i32_0 : i32
    scf.if %2 {
      %cst_30 = arith.constant 0.000000e+00 : f32
      %50 = vector.broadcast %cst_30 : f32 to vector<1x1x1xf32>
      %c0_31 = arith.constant 0 : index
      %c0_32 = arith.constant 0 : index
      %c0_33 = arith.constant 0 : index
      %51 = vector.load %arg4[%c0_31, %c0_32, %c0_33] : memref<1x1x1xf32, #tpu.memory_space<vmem>>, vector<1x1x1xf32>
      tpu.vector_store %arg4[%c0_31, %c0_32, %c0_33], %50 {strides = array<i32>} : memref<1x1x1xf32, #tpu.memory_space<vmem>>, vector<1x1x1xf32>,
      %cst_34 = arith.constant 0.000000e+00 : f32
      %52 = vector.broadcast %cst_34 : f32 to vector<1x1x1xf32>
      %c0_35 = arith.constant 0 : index
      %c0_36 = arith.constant 0 : index
      %c0_37 = arith.constant 0 : index
      %53 = vector.load %arg5[%c0_35, %c0_36, %c0_37] : memref<1x1x1xf32, #tpu.memory_space<vmem>>, vector<1x1x1xf32>
      tpu.vector_store %arg5[%c0_35, %c0_36, %c0_37], %52 {strides = array<i32>} : memref<1x1x1xf32, #tpu.memory_space<vmem>>, vector<1x1x1xf32>,
      %cst_38 = arith.constant 0.000000e+00 : f32
      %54 = vector.broadcast %cst_38 : f32 to vector<1x1x1xf32>
      %c0_39 = arith.constant 0 : index
      %c0_40 = arith.constant 0 : index
      %c0_41 = arith.constant 0 : index
      %55 = vector.load %arg6[%c0_39, %c0_40, %c0_41] : memref<1x1x1xf32, #tpu.memory_space<vmem>>, vector<1x1x1xf32>
      tpu.vector_store %arg6[%c0_39, %c0_40, %c0_41], %54 {strides = array<i32>} : memref<1x1x1xf32, #tpu.memory_space<vmem>>, vector<1x1x1xf32>,
    } else {
    }
    %c0 = arith.constant 0 : index
    %c0_1 = arith.constant 0 : index
    %c0_2 = arith.constant 0 : index
    %3 = vector.load %arg2[%c0, %c0_1, %c0_2] : memref<1x4x256xf32, #tpu.memory_space<vmem>>, vector<1x4x256xf32>
    %4 = vector.shape_cast %3 : vector<1x4x256xf32> to vector<4x256xf32>
    %c0_3 = arith.constant 0 : index
    %c0_4 = arith.constant 0 : index
    %c0_5 = arith.constant 0 : index
    %5 = vector.load %arg3[%c0_3, %c0_4, %c0_5] : memref<1x4x256xf32, #tpu.memory_space<vmem>>, vector<1x4x256xf32>
    %6 = vector.shape_cast %5 : vector<1x4x256xf32> to vector<4x256xf32>
    %7 = arith.subf %4, %6 : vector<4x256xf32>
    %c0_6 = arith.constant 0 : index
    %c0_7 = arith.constant 0 : index
    %c0_8 = arith.constant 0 : index
    %8 = vector.load %arg4[%c0_6, %c0_7, %c0_8] : memref<1x1x1xf32, #tpu.memory_space<vmem>>, vector<1x1x1xf32>
    %9 = arith.mulf %7, %7 : vector<4x256xf32>
    %10 = vector.shape_cast %9 : vector<4x256xf32> to vector<1x4x256xf32>
    %cst = arith.constant dense<0.000000e+00> : vector<1xf32>
    %11 = vector.multi_reduction <add>, %10, %cst [1, 2] : vector<1x4x256xf32> to vector<1xf32>
    %12 = vector.shape_cast %11 : vector<1xf32> to vector<1x1x1xf32>
    %13 = vector.extract %12[0, 0, 0] : f32 from vector<1x1x1xf32>
    %14 = vector.broadcast %13 : f32 to vector<1x1x1xf32>
    %15 = arith.addf %8, %14 : vector<1x1x1xf32>
    %c0_9 = arith.constant 0 : index
    %c0_10 = arith.constant 0 : index
    %c0_11 = arith.constant 0 : index
    %16 = vector.load %arg4[%c0_9, %c0_10, %c0_11] : memref<1x1x1xf32, #tpu.memory_space<vmem>>, vector<1x1x1xf32>
    tpu.vector_store %arg4[%c0_9, %c0_10, %c0_11], %15 {strides = array<i32>} : memref<1x1x1xf32, #tpu.memory_space<vmem>>, vector<1x1x1xf32>,
    %17 = tpu.iota {dimensions = array<i32: 1>} : vector<4x256xi32>
    %c15_i32 = arith.constant 15 : i32
    %18 = vector.broadcast %c15_i32 : i32 to vector<4x256xi32>
    %19 = arith.andi %17, %18 : vector<4x256xi32>
    %c1_i32 = arith.constant 1 : i32
    %20 = tpu.dynamic_rotate %4 by %c1_i32 dim 1 : vector<4x256xf32>, i32 -> vector<4x256xf32>
    %21 = arith.subf %4, %20 : vector<4x256xf32>
    %c0_i32_12 = arith.constant 0 : i32
    %22 = vector.broadcast %c0_i32_12 : i32 to vector<4x256xi32>
    %23 = arith.cmpi ne, %19, %22 : vector<4x256xi32>
    %cst_13 = arith.constant 0.000000e+00 : f32
    %24 = vector.broadcast %cst_13 : f32 to vector<4x256xf32>
    %25 = arith.select %23, %21, %24 : vector<4x256xi1>, vector<4x256xf32>
    %c0_14 = arith.constant 0 : index
    %c0_15 = arith.constant 0 : index
    %c0_16 = arith.constant 0 : index
    %26 = vector.load %arg6[%c0_14, %c0_15, %c0_16] : memref<1x1x1xf32, #tpu.memory_space<vmem>>, vector<1x1x1xf32>
    %27 = arith.mulf %25, %25 : vector<4x256xf32>
    %28 = vector.shape_cast %27 : vector<4x256xf32> to vector<1x4x256xf32>
    %cst_17 = arith.constant dense<0.000000e+00> : vector<1xf32>
    %29 = vector.multi_reduction <add>, %28, %cst_17 [1, 2] : vector<1x4x256xf32> to vector<1xf32>
    %30 = vector.shape_cast %29 : vector<1xf32> to vector<1x1x1xf32>
    %31 = vector.extract %30[0, 0, 0] : f32 from vector<1x1x1xf32>
    %32 = vector.broadcast %31 : f32 to vector<1x1x1xf32>
    %33 = arith.addf %26, %32 : vector<1x1x1xf32>
    %c0_18 = arith.constant 0 : index
    %c0_19 = arith.constant 0 : index
    %c0_20 = arith.constant 0 : index
    %34 = vector.load %arg6[%c0_18, %c0_19, %c0_20] : memref<1x1x1xf32, #tpu.memory_space<vmem>>, vector<1x1x1xf32>
    tpu.vector_store %arg6[%c0_18, %c0_19, %c0_20], %33 {strides = array<i32>} : memref<1x1x1xf32, #tpu.memory_space<vmem>>, vector<1x1x1xf32>,
    %c16_i32 = arith.constant 16 : i32
    %35 = tpu.dynamic_rotate %4 by %c16_i32 dim 1 : vector<4x256xf32>, i32 -> vector<4x256xf32>
    %36 = arith.subf %4, %35 : vector<4x256xf32>
    %c16_i32_21 = arith.constant 16 : i32
    %37 = vector.broadcast %c16_i32_21 : i32 to vector<4x256xi32>
    %38 = arith.cmpi sge, %17, %37 : vector<4x256xi32>
    %cst_22 = arith.constant 0.000000e+00 : f32
    %39 = vector.broadcast %cst_22 : f32 to vector<4x256xf32>
    %40 = arith.select %38, %36, %39 : vector<4x256xi1>, vector<4x256xf32>
    %c0_23 = arith.constant 0 : index
    %c0_24 = arith.constant 0 : index
    %c0_25 = arith.constant 0 : index
    %41 = vector.load %arg5[%c0_23, %c0_24, %c0_25] : memref<1x1x1xf32, #tpu.memory_space<vmem>>, vector<1x1x1xf32>
    %42 = arith.mulf %40, %40 : vector<4x256xf32>
    %43 = vector.shape_cast %42 : vector<4x256xf32> to vector<1x4x256xf32>
    %cst_26 = arith.constant dense<0.000000e+00> : vector<1xf32>
    %44 = vector.multi_reduction <add>, %43, %cst_26 [1, 2] : vector<1x4x256xf32> to vector<1xf32>
    %45 = vector.shape_cast %44 : vector<1xf32> to vector<1x1x1xf32>
    %46 = vector.extract %45[0, 0, 0] : f32 from vector<1x1x1xf32>
    %47 = vector.broadcast %46 : f32 to vector<1x1x1xf32>
    %48 = arith.addf %41, %47 : vector<1x1x1xf32>
    %c0_27 = arith.constant 0 : index
    %c0_28 = arith.constant 0 : index
    %c0_29 = arith.constant 0 : index
    %49 = vector.load %arg5[%c0_27, %c0_28, %c0_29] : memref<1x1x1xf32, #tpu.memory_space<vmem>>, vector<1x1x1xf32>
    tpu.vector_store %arg5[%c0_27, %c0_28, %c0_29], %48 {strides = array<i32>} : memref<1x1x1xf32, #tpu.memory_space<vmem>>, vector<1x1x1xf32>,
    return
  }
  func.func @transform_0(%arg0: i32, %arg1: i32) -> (i32, i32, i32) {
    %c1_i32 = arith.constant 1 : i32
    %0 = arith.muli %arg0, %c1_i32 : i32
    %1 = arith.addi %0, %arg1 : i32
    %c0_i32 = arith.constant 0 : i32
    %c0_i32_0 = arith.constant 0 : i32
    %c0_i32_1 = arith.constant 0 : i32
    return %1, %c0_i32, %c0_i32_0 : i32, i32, i32
  }
  func.func @transform_1(%arg0: i32, %arg1: i32) -> (i32, i32, i32) {
    %c1_i32 = arith.constant 1 : i32
    %0 = arith.muli %arg0, %c1_i32 : i32
    %1 = arith.addi %0, %arg1 : i32
    %c0_i32 = arith.constant 0 : i32
    %c0_i32_0 = arith.constant 0 : i32
    %c0_i32_1 = arith.constant 0 : i32
    return %1, %c0_i32, %c0_i32_0 : i32, i32, i32
  }
  func.func @transform_2(%arg0: i32, %arg1: i32) -> (i32, i32, i32) {
    %c0_i32 = arith.constant 0 : i32
    %c0_i32_0 = arith.constant 0 : i32
    %c0_i32_1 = arith.constant 0 : i32
    return %arg0, %c0_i32, %c0_i32_0 : i32, i32, i32
  }
  func.func @transform_3(%arg0: i32, %arg1: i32) -> (i32, i32, i32) {
    %c0_i32 = arith.constant 0 : i32
    %c0_i32_0 = arith.constant 0 : i32
    %c0_i32_1 = arith.constant 0 : i32
    return %arg0, %c0_i32, %c0_i32_0 : i32, i32, i32
  }
  func.func @transform_4(%arg0: i32, %arg1: i32) -> (i32, i32, i32) {
    %c0_i32 = arith.constant 0 : i32
    %c0_i32_0 = arith.constant 0 : i32
    %c0_i32_1 = arith.constant 0 : i32
    return %arg0, %c0_i32, %c0_i32_0 : i32, i32, i32
  }
}

</mosaic_0001>

<bundles_post_ra>
// kernel: tpu_custom_call.1
= control target key start
LH: loop header
LB: loop body
LE: loop exit
PB: predicated region body
PF: predicated region fallthrough
CT: control target
= control target key end

     0   :  { %10 = vsyncpa [#allocation3], 0  ;;  %s977_s0 = inlined_call_operand.hbm [shape: f32[2,4,256], index: 0, kind: input, shape index: {}]   ;;  %s978_s1 = inlined_call_operand.hbm [shape: f32[2,4,256], index: 1, kind: input, shape index: {}]   ;;  %s979_s2 = inlined_call_operand.vmem [shape: f32[2,1,1], index: 2, kind: output, shape index: {0}]   ;;  %s980_s3 = inlined_call_operand.vmem [shape: f32[2,1,1], index: 3, kind: output, shape index: {1}]   ;;  %s981_s4 = inlined_call_operand.vmem [shape: f32[2,1,1], index: 4, kind: output, shape index: {2}]  }
   0x1   :  { %12 = vsyncpa [#allocation3 + $0x1], 0 }
   0x2   :  { %13 = vsyncpa [#allocation5], 0 }
   0x3   :  { %15 = vsyncpa [#allocation5 + $0x1], 0  ;;  %s777_s15 = smov 0   ;;  %s779_s16 = smov 0  }
   0x4   :  { %s781_s17 = smov 0   ;;  %s783_s18 = smov 0  }
   0x5   :  { %s785_s19 = smov 0   ;;  %s787_s20 = smov 0  }
   0x6 LB: > { %s544_s21 = sadd.s32 4294967295, %s745_s20   ;;  %s33_s22 = sadd.s32 1, %s741_s19  ;;  %s745_s20 = sphi %s787_s20, %s21_s20   ;;  %s741_s19 = sphi %s785_s19, %s995_s19   ;;  %s737_s18 = sphi %s783_s18, %s994_s18   ;;  %s733_s17 = sphi %s781_s17, %s993_s17   ;;  %s729_s16 = sphi %s779_s16, %s992_s16   ;;  %s725_s15 = sphi %s777_s15, %s991_s15  }
   0x7   : > { %p35_p0 = scmp.ge.s32.totalorder %s33_s22, 2  ;;  %s42_s23 = sadd.s32 1, %s733_s17 }
   0x8   : > { %p49_p1 = scmp.ne.s32.totalorder %s733_s17, %s729_s16  ;;  %p50_p2 = scmp.eq.s32.totalorder %s745_s20, 0 }
   0x9   : > { %s997_s22 = smov (%p35_p0, %s33_s22), 0  ;;  %p55_p4 = scmp.ne.s32.totalorder %s729_s16, %s725_s15 }
   0xa   : > { %p813_p3 = por %p50_p2, %p49_p1  ;;  %s39_s25 = ssub.s32 %s741_s19, %s997_s22 }
   0xb   : > { %p56_p5 = scmp.eq.s32.totalorder %s544_s21, 0  ;;  %p40_p6 = scmp.eq.s32.totalorder %s39_s25, 0 }
   0xc   : > { %p578_p8 = scmp.lt.s32.totalorder %s745_s20, 2  ;;  %s829_s28 = sand.u32 1, %s733_s17  }
   0xd   : > { %p820_p7 = por %p56_p5, %p55_p4  ;;  %s559_s29 = sshll.u32 %s741_s19, 7 }
   0xe   : > { %s826_s27 = scalar_select %p40_p6, %s733_s17, %s42_s23  }
   0xf   : > { %s984_s26 = scalar_select %p820_p7, 1, 0 }
  0x10   : > { %s548_s30 = sshll.u32 %s829_s28, 3  ;;  %s838_s7 = scalar_lea.hbm %s977_s0, %s559_s29 }
  0x11   : > { %s189_s8 = scalar_lea.vmem [#allocation2], %s548_s30  ;;  %p844_p9 = pnand %p578_p8, %p813_p3 }
  0x12   : > { %s198_s9 = sshll.u32 %s189_s8, 4  ;;  %s186_s11 = scalar_lea.sflag [#allocation3], %s829_s28  ;;  %s848_s9 = int_to_ptr.vmem [resolvable:$true] %s198_s9 }
  0x13   : > { %s631_s12 = scalar_lea.hbm %s838_s7, 128  ;;  %p633_p13 = pneg %p844_p9 }
  0x14   : > { %p632_p12 = scmp.ne.s32.totalorder %s838_s7, %s631_s12  ;;  %s636_s15 = scalar_lea.hbm %s977_s0, 256 }
  0x15   : > { %p637_p2 = scmp.lt.u32.totalorder %s838_s7, %s977_s0  ;;  %p638_p3 = scmp.lt.u32.totalorder %s636_s15, %s631_s12 }
  0x16   : > { %p634_p0 = pnand %p633_p13, %p632_p12  ;;  %p640_p5 = scmp.lt.u32.totalorder %s631_s12, %s838_s7 }
  0x17   : > { %p639_p4 = por %p638_p3, %p637_p2 }
  0x18   : > { %p635_p1 = pneg %p634_p0 }
  0x19   : > { %p641_p6 = por %p640_p5, %p639_p4 }
  0x1b   : > { %p642_p8 = pnand %p641_p6, %p635_p1 }
  0x1d   : > { %645 = shalt.err (!%p642_p8)
}
  0x1e   : > { %s646_s24 = scalar_lea.vmem %s848_s9, 128  ;;  %s747_s25 = smov [#allocation2]  }
  0x1f   : > { %p647_p12 = scmp.ne.s32.totalorder %s848_s9, %s646_s24  ;;  %s651_s5 = sshll.u32 %s747_s25, 4  ;;  %s652_s5 = int_to_ptr.vmem [resolvable:$false] %s651_s5 }
  0x20   : > { %s653_s6 = scalar_lea.vmem %s652_s5, 256  ;;  %p654_p11 = scmp.lt.s32.totalorder %s848_s9, %s652_s5 }
  0x21   : > { %p649_p0 = pnand %p647_p12, %p633_p13  ;;  %p655_p2 = scmp.lt.s32.totalorder %s653_s6, %s646_s24 }
  0x23   : > { %p650_p10 = pneg %p649_p0  ;;  %p656_p3 = por %p655_p2, %p654_p11 }
  0x25   : > { %p657_p4 = pnand %p656_p3, %p650_p10 }
  0x27   : > { %660 = shalt.err (!%p657_p4)
}
  0x28   : > { %574 = dma.hbm_to_vmem [thread:$0]  (!%p844_p9), %s838_s7, 128, %s848_s9, %s186_s11  }
  0x29   : > { %p986_p1 = scmp.lt.s32.totalorder %s745_s20, 3  ;;  %p987_p5 = scmp.ge.s32.totalorder %s745_s20, 1 }
  0x2a   : > { %s891_s14 = scalar_lea.hbm %s978_s1, %s559_s29  ;;  %s209_s15 = scalar_lea.vmem [#allocation4], %s548_s30 }
  0x2b   : > { %p882_p6 = pnand %p987_p5, %p986_p1  ;;  %s218_s21 = sshll.u32 %s209_s15, 4  ;;  %s219_s21 = int_to_ptr.vmem [resolvable:$true] %s218_s21 }
  0x2c   : > { %s206_s7 = scalar_lea.sflag [#allocation5], %s829_s28  ;;  %s661_s9 = scalar_lea.hbm %s891_s14, 128 }
  0x2d   : > { %s988_s8 = scalar_select %p882_p6, 1, 0 }
  0x2e   : > { %p662_p10 = scmp.ne.s32.totalorder %s891_s14, %s661_s9  ;;  %s666_s29 = scalar_lea.hbm %s978_s1, 256 }
  0x2f   : > { %p667_p12 = scmp.lt.u32.totalorder %s891_s14, %s978_s1  ;;  %p668_p0 = scmp.lt.u32.totalorder %s666_s29, %s661_s9 }
  0x30   : > { %p664_p11 = pnand %p662_p10, %p633_p13  ;;  %p670_p3 = scmp.lt.u32.totalorder %s661_s9, %s891_s14 }
  0x31   : > { %p669_p2 = por %p668_p0, %p667_p12 }
  0x32   : > { %p665_p8 = pneg %p664_p11 }
  0x33   : > { %p671_p4 = por %p670_p3, %p669_p2 }
  0x35   : > { %p672_p1 = pnand %p671_p4, %p665_p8 }
  0x37   : > { %675 = shalt.err (!%p672_p1)
}
  0x38   : > { %s676_s28 = scalar_lea.vmem %s219_s21, 128  ;;  %s748_s30 = smov [#allocation4]  }
  0x39   : > { %p677_p5 = scmp.ne.s32.totalorder %s219_s21, %s676_s28  ;;  %s681_s5 = sshll.u32 %s748_s30, 4  ;;  %s682_s5 = int_to_ptr.vmem [resolvable:$false] %s681_s5 }
  0x3a   : > { %s683_s6 = scalar_lea.vmem %s682_s5, 256  ;;  %p684_p7 = scmp.lt.s32.totalorder %s219_s21, %s682_s5 }
  0x3b   : > { %p679_p10 = pnand %p677_p5, %p633_p13  ;;  %p685_p6 = scmp.lt.s32.totalorder %s683_s6, %s676_s28 }
  0x3d   : > { %p680_p11 = pneg %p679_p10  ;;  %p686_p0 = por %p685_p6, %p684_p7 }
  0x3f   : > { %p687_p12 = pnand %p686_p0, %p680_p11 }
  0x41   : > { %690 = shalt.err (!%p687_p12)
}
  0x42   : > { %577 = dma.hbm_to_vmem [thread:$0]  (!%p844_p9), %s891_s14, 128, %s219_s21, %s206_s7  }
  0x43   : > { %p989_p8 = scmp.ne.s32.totalorder %s988_s8, 0 }
  0x44   : > { %s229_s12 = sand.u32 (!%p989_p8), 1, %s729_s16   ;;  %p990_p13 = scmp.ne.s32.totalorder (!%p989_p8), %s984_s26, 0 }
  0x45   : > { %227 = sbr.rel (%p989_p8) target bundleno = 421 (0x1a5), region = 28  ;;  %s555_s13 = sshll.u32 (!%p989_p8), %s229_s12, 3 }
  0x46   : > { %s230_s15 = scalar_lea.sflag (!%p989_p8), [#allocation3], %s229_s12  ;;  %s233_s9 = scalar_lea.vmem (!%p989_p8), [#allocation2], %s555_s13 }
  0x4c   : > { %716 = dma.done.wait (%p990_p13), %s230_s15, 128  }
  0x4d   : > { %718 = vsyncadd (%p990_p13), %s230_s15, 4294967168  ;;  %s239_s11 = scalar_lea.sflag [#allocation5], %s229_s12  ;;  %s242_s23 = scalar_lea.vmem [#allocation4], %s555_s13 }
  0x4e   : > { %720 = dma.done.wait (%p990_p13), %s239_s11, 128  }
  0x4f   : > { %722 = vsyncadd (%p990_p13), %s239_s11, 4294967168  ;;  %v295_v0 = vld [vmem:[%s233_s9] sm:$0xff]  ;;  %s749_s10 = smov 16   ;;  %s750_s8 = smov 1   ;;  %v296_v2 = vld [vmem:[%s242_s23] sm:$0xff]  ;;  %vm303_vm0 = vcmask 1043456   ;;  %v320_v9 = vlaneseq }
  0x50   : > { %365 = vrot.lane.b32.xlu1 %v295_v0, %s749_s10  ;;  %328 = vrot.lane.b32.xlu0 %v295_v0, %s750_s8  ;;  %v326_v1 = vcombine.high %v295_v0, %v295_v0  ;;  %v297_v3 = vsub.f32 %v295_v0, %v296_v2  ;;  %p278_p7 = scmp.lt.s32.totalorder %s737_s18, 1  ;;  %vm291_vm6 = vcmask 0   ;;  %v751_v41 = vmov 0.0  }
  0x51   : > { %v321_v10 = vand.u32 127, %v320_v9 }
  0x52   : > { %v299_v4 = vmul.f32 %v297_v3, %v297_v3  ;;  %s999_s18 = smov (!%p278_p7, %s737_s18), 1 }
  0x53   : > { %v322_v13 = vadd.s32 128, %v321_v10  ;;  %vm369_vm1 = vcmp.lt.s32.totalorder %v321_v10, 16  ;;  %vm332_vm2 = vcmp.lt.s32.totalorder %v321_v10, 1  ;;  %v323_v14 = vand.u32 15, %v321_v10  ;;  %s280_s21 = scalar_lea.vmem %s979_s2, %s999_s18  ;;  %s940_s24 = scalar_lea.vmem %s981_s4, %s999_s18 }
  0x54   : > { %367 = vrot.lane.b32.xlu1 %v326_v1, %s749_s10  ;;  %330 = vrot.lane.b32.xlu0 %v326_v1, %s750_s8  ;;  %v301_v5 = vcombine.high %v299_v4, %v299_v4  ;;  %v304_v6 = vsel %vm303_vm0, %v299_v4, 0.0  ;;  %vm377_vm3 = vcmp.ge.s32.totalorder %v321_v10, 16  ;;  %292 = vst.msk [vmem:[%s280_s21] sm:$0x1] %vm291_vm6, %v751_v41  ;;  %294 = vst.msk [vmem:[%s940_s24] sm:$0x1] %vm291_vm6, %v751_v41  ;;  %s948_s30 = scalar_lea.vmem %s980_s3, %s999_s18 }
  0x55   : > { %v324_v17 = vand.u32 15, %v322_v13  ;;  %vm340_vm4 = vcmp.ne.s32.totalorder %v323_v14, 0  ;;  %293 = vst.msk [vmem:[%s948_s30] sm:$0x1] %vm291_vm6, %v751_v41 }
  0x56   : > { %v305_v7 = vsel %vm303_vm0, %v301_v5, 0.0 }
  0x57   : > { %v306_v8 = vadd.f32 %v305_v7, %v304_v6  ;;  %vm341_vm5 = vcmp.ne.s32.totalorder %v324_v17, 0 }
  0x5b   : > { %v298_v49 = vld [vmem:[%s280_s21] sm:$0x1] }
  0x5c   : > { %v347_v2 = vld [vmem:[%s940_s24] sm:$0x1] }
  0x5d   : > { %v384_v3 = vld [vmem:[%s948_s30] sm:$0x1] }
  0x73   : > { %307 = vadd.xlane.f32.xlu0 %v306_v8 }
  0xc2   : > { %v366_v11 = vpop.permute.xlu1 %365  ;;  %v329_v12 = vpop.permute.xlu0 %328 }
  0xc6   : > { %v368_v15 = vpop.permute.xlu1 %367  ;;  %v331_v16 = vpop.permute.xlu0 %330 }
  0xc7   : > { %v370_v18 = vsel %vm369_vm1, %v366_v11, %v368_v15  ;;  %v371_v19 = vsel %vm369_vm1, %v368_v15, %v366_v11  ;;  %v333_v20 = vsel %vm332_vm2, %v329_v12, %v331_v16  ;;  %v334_v21 = vsel %vm332_vm2, %v331_v16, %v329_v12 }
  0xc8   : > { %v374_v22 = vcombine.low %v371_v19, %v370_v18  ;;  %v337_v23 = vcombine.low %v334_v21, %v333_v20 }
  0xca   : > { %v376_v24 = vsub.f32 %v295_v0, %v374_v22  ;;  %v339_v25 = vsub.f32 %v295_v0, %v337_v23 }
  0xcc   : > { %v380_v26 = vcombine.high %v376_v24, %v376_v24  ;;  %v382_v27 = vsel %vm377_vm3, %v376_v24, 0.0  ;;  %v343_v28 = vcombine.high %v339_v25, %v339_v25  ;;  %v345_v29 = vsel %vm340_vm4, %v339_v25, 0.0 }
  0xcd   : > { %v385_v30 = vmul.f32 %v382_v27, %v382_v27  ;;  %v348_v31 = vmul.f32 %v345_v29, %v345_v29 }
  0xce   : > { %v386_v32 = vmul.f32 %v380_v26, %v380_v26  ;;  %v346_v33 = vsel %vm341_vm5, %v343_v28, 0.0 }
  0xcf   : > { %v387_v34 = vsel %vm303_vm0, %v385_v30, 0.0  ;;  %v349_v35 = vmul.f32 %v346_v33, %v346_v33  ;;  %v350_v38 = vsel %vm303_vm0, %v348_v31, 0.0 }
  0xd0   : > { %v388_v36 = vsel %vm303_vm0, %v386_v32, 0.0 }
  0xd1   : > { %v389_v37 = vadd.f32 %v388_v36, %v387_v34  ;;  %v351_v39 = vsel %vm303_vm0, %v349_v35, 0.0 }
  0xd2   : > { %v352_v40 = vadd.f32 %v351_v39, %v350_v38 }
  0xd3   : > { %390 = vadd.xlane.f32.xlu0 %v389_v37 }
  0xd4   : > { %353 = vadd.xlane.f32.xlu1 %v352_v40 }
 0x100   : > { %v308_v42 = vpop.xlane.xlu0 %307 }
 0x101   : > { %v309_v43 = vrot.slane %v308_v42, 4 }
 0x103   : > { %v310_v44 = vadd.f32 %v309_v43, %v308_v42 }
 0x105   : > { %v311_v45 = vrot.slane %v310_v44, 2 }
 0x107   : > { %v312_v46 = vadd.f32 %v311_v45, %v310_v44 }
 0x109   : > { %v313_v47 = vrot.slane %v312_v46, 1 }
 0x10b   : > { %v314_v48 = vadd.f32 %v313_v47, %v312_v46 }
 0x10d   : > { %561 = vpush %v314_v48 }
 0x13e   : > { %s562_s5 = spop %561 }
 0x13f   : > { %v316_v50 = vstv %s562_s5 }
 0x140   : > { %v317_v51 = vadd.f32 %v316_v50, %v298_v49 }
 0x142   : > { %319 = vst.msk [vmem:[%s280_s21] sm:$0x1] %vm291_vm6, %v317_v51 }
 0x160   : > { %v391_v52 = vpop.xlane.xlu0 %390 }
 0x161   : > { %v392_v53 = vrot.slane %v391_v52, 4  ;;  %v354_v54 = vpop.xlane.xlu1 %353 }
 0x162   : > { %v355_v55 = vrot.slane %v354_v54, 4 }
 0x163   : > { %v393_v56 = vadd.f32 %v392_v53, %v391_v52 }
 0x164   : > { %v356_v57 = vadd.f32 %v355_v55, %v354_v54 }
 0x165   : > { %v394_v58 = vrot.slane %v393_v56, 2 }
 0x166   : > { %v357_v59 = vrot.slane %v356_v57, 2 }
 0x167   : > { %v395_v60 = vadd.f32 %v394_v58, %v393_v56 }
 0x168   : > { %v358_v61 = vadd.f32 %v357_v59, %v356_v57 }
 0x169   : > { %v396_v62 = vrot.slane %v395_v60, 1 }
 0x16a   : > { %v359_v63 = vrot.slane %v358_v61, 1 }
 0x16b   : > { %v397_v0 = vadd.f32 %v396_v62, %v395_v60 }
 0x16c   : > { %v360_v1 = vadd.f32 %v359_v63, %v358_v61 }
 0x16e   : > { %563 = vpush %v360_v1 }
 0x16f   : > { %565 = vpush %v397_v0 }
 0x19f   : > { %s564_s18 = spop %563 }
 0x1a0   : > { %v362_v4 = vstv %s564_s18  ;;  %s566_s6 = spop %565 }
 0x1a1   : > { %v363_v5 = vadd.f32 %v362_v4, %v347_v2  ;;  %v399_v6 = vstv %s566_s6 }
 0x1a2   : > { %v400_v7 = vadd.f32 %v399_v6, %v384_v3 }
 0x1a3   : > { %364 = vst.msk [vmem:[%s940_s24] sm:$0x1] %vm291_vm6, %v363_v5 }
 0x1a4   : > { %401 = vst.msk [vmem:[%s948_s30] sm:$0x1] %vm291_vm6, %v400_v7 }
 0x1a5 PF: > { %s21_s20 = sadd.s32 1, %s745_s20   ;;  %s991_s15 = smov %s729_s16 }
 0x1a6   : > { %p18_p9 = scmp.ge.s32.totalorder %s21_s20, 4   ;;  %s992_s16 = smov %s733_s17 }
 0x1a7   : > { %s993_s17 = smov %s826_s27  ;;  %s994_s18 = smov %s741_s19 }
 0x1a8   : > { %s995_s19 = smov %s997_s22  ;;  %20 = sbr.rel (!%p18_p9) target bundleno = 6 (0x6), region = 109 }
 0x1af   :  { %443 = vsyncpa [#allocation3], 1 }
 0x1b0   :  { %445 = vsyncpa [#allocation3 + $0x1], 1 }
 0x1b1   :  { %446 = vsyncpa [#allocation5], 1 }
 0x1b2   :  { %448 = vsyncpa [#allocation5 + $0x1], 1 }

</bundles_post_ra>
